<compile_context>
chip_gen: v5e
topology: v5e:2x2
jax: 0.10.0
libtpu: 0.0.40
codegen_flags: <defaults>
</compile_context>

<pallas_src>
import functools

import jax
import jax.numpy as jnp
from jax.experimental import pallas as pl
from jax.experimental.pallas import tpu as pltpu


def _gaussian_kernel(x_ref, o_ref, *, coef):
    # Compute the exp argument in f32 for accuracy; the cast is hidden behind
    # HBM traffic for narrower dtypes (memory-bound kernel).
    xf = x_ref[...].astype(jnp.float32)
    o_ref[...] = jnp.exp(coef * xf * xf).astype(o_ref.dtype)


def _target_block_bytes() -> int:
    """Generation-dependent target block size for this HBM-bound elementwise op."""
    try:
        kind = jax.devices()[0].device_kind.lower()
    except Exception:  # pragma: no cover - defensive; fall back to safe default
        return 4 * 1024 * 1024
    if "v7" in kind:
        # Higher HBM BW -> amortize per-step overhead; 4x10 MiB buffers stay
        # well under v7x's 64 MiB per-TC VMEM.
        return 10 * 1024 * 1024
    if "v6" in kind:
        return 8 * 1024 * 1024
    return 4 * 1024 * 1024  # v5e and anything unknown


def gaussian(x: jax.Array, mean: float = 0.0, sigma: float = 0.1,
             donate_x: bool = False) -> jax.Array:
    """Elementwise Gaussian activation via Pallas. Matches the PyTorch module."""
    del mean  # unused in the forward pass (kept for signature parity)
    coef = -0.5 / float(sigma) ** 2  # folded constant

    orig_shape = x.shape
    dtype = x.dtype
    itemsize = jnp.dtype(dtype).itemsize
    total = x.size

    # --- choose a lane-dense slab width; keep the reshape a pure metadata op ---
    width = None
    for w in (1024, 512, 256, 128):
        if total % w == 0:
            width = w
            break

    x_flat = x.reshape(-1)
    tail = None
    if width is None:
        # Ragged size (rare): run the kernel on the 128-aligned prefix and
        # handle the <128-element tail with a tiny jnp epilogue. This avoids
        # padding/slicing the full array around the pallas_call.
        width = 128
        main = (total // width) * width
        if main == 0:
            # Whole array smaller than one lane row: not worth a kernel launch.
            xf = x_flat.astype(jnp.float32)
            return jnp.exp(coef * xf * xf).astype(dtype).reshape(orig_shape)
        tail = x_flat[main:]
        x_flat = x_flat[:main]

    rows = x_flat.size // width
    x2d = x_flat.reshape(rows, width)

    # --- pick block size: target bytes per block, >=2 (even) grid steps if possible ---
    # min sublane multiple: 8 for 4-byte, 16 for 2-byte, 32 for 1-byte dtypes
    min_sub = 8 * max(1, 4 // itemsize)
    bytes_per_row = width * itemsize
    rows_rounded = pl.cdiv(rows, min_sub) * min_sub
    target_block_bytes = _target_block_bytes()

    steps = max(1, pl.cdiv(rows_rounded * bytes_per_row, target_block_bytes))
    if rows_rounded >= 2 * min_sub:
        # Guarantee at least 2 (and an even number of) grid steps so the
        # "parallel" grid axis can shard evenly across v7x's two TensorCores.
        steps = max(steps, 2)
        if steps % 2 == 1:
            steps += 1
    tile_rows = pl.cdiv(pl.cdiv(rows_rounded, steps), min_sub) * min_sub
    tile_rows = min(max(tile_rows, min_sub), rows_rounded)
    grid = (pl.cdiv(rows, tile_rows),)

    # VMEM budget: 2x input + 2x output double-buffers plus a small margin for
    # compiler-internal scratch. Sized to the actual block instead of 48 MiB.
    block_bytes = tile_rows * width * itemsize
    vmem_limit = min(max(4 * block_bytes + 2 * 1024 * 1024, 8 * 1024 * 1024),
                     100 * 1024 * 1024)

    kernel = functools.partial(_gaussian_kernel, coef=coef)

    n_kernel = rows * width
    cost = pl.CostEstimate(
        flops=2 * n_kernel,
        transcendentals=n_kernel,
        bytes_accessed=2 * n_kernel * itemsize,
    )

    extra_kwargs = {}
    if donate_x:
        # Same shape/dtype in and out -> safe to alias; saves a full-size
        # output allocation when the caller donates x.
        extra_kwargs["input_output_aliases"] = {0: 0}

    out2d = pl.pallas_call(
        kernel,
        out_shape=jax.ShapeDtypeStruct((rows, width), dtype),
        grid=grid,
        in_specs=[pl.BlockSpec((tile_rows, width), lambda i: (i, 0))],
        out_specs=pl.BlockSpec((tile_rows, width), lambda i: (i, 0)),
        compiler_params=pltpu.CompilerParams(
            dimension_semantics=("parallel",),
            vmem_limit_bytes=vmem_limit,
        ),
        cost_estimate=cost,
        **extra_kwargs,
    )(x2d)

    out_flat = out2d.reshape(-1)
    if tail is not None:
        tf = tail.astype(jnp.float32)
        tail_out = jnp.exp(coef * tf * tf).astype(dtype)
        # TODO(synk): concatenate still copies the kernel output once; a
        # donated-output dynamic_update_slice would remove that last pass.
        out_flat = jnp.concatenate([out_flat, tail_out])
    return out_flat.reshape(orig_shape)


if __name__ == "__main__":
    key = jax.random.PRNGKey(0)
    # NCHW input consistent with a conv-backbone activation
    x = jax.random.normal(key, (2, 4, 16, 16), dtype=jnp.float32)

    out = gaussian(x, mean=0.0, sigma=0.1)
    out = jax.block_until_ready(out)

    # reference check in plain JAX
    ref = jnp.exp(-0.5 * x ** 2 / (0.1 ** 2))
    assert out.shape == x.shape and out.dtype == x.dtype
    assert jnp.allclose(out, ref, atol=1e-6, rtol=1e-6)

    # also exercise a ragged size (prefix-kernel + tail-epilogue path)
    xr = jax.random.normal(key, (7, 13), dtype=jnp.float32) * 0.2
    outr = jax.block_until_ready(gaussian(xr))
    refr = jnp.exp(-0.5 * xr ** 2 / (0.1 ** 2))
    assert jnp.allclose(outr, refr, atol=1e-6, rtol=1e-6)

    print("KERNEL_OK")
</pallas_src>

<mosaic_0001>
module attributes {stable_mosaic.version = 11 : i64} {
  func.func @_gaussian_kernel(%arg0: i32, %arg1: memref<8x1024xf32, #tpu.memory_space<vmem>>, %arg2: memref<8x1024xf32, #tpu.memory_space<vmem>>) attributes {dimension_semantics = [#tpu.dimension_semantics<parallel>], iteration_bounds = array<i64: 1>, scalar_prefetch = 0 : i64, scratch_operands = 0 : i64, tpu.core_type = #tpu.core_type<tc>, window_params = [{transform_indices = @transform_0, window_bounds = array<i64: 8, 1024>}, {transform_indices = @transform_1, window_bounds = array<i64: 8, 1024>}]} {
    %c0 = arith.constant 0 : index
    %c0_0 = arith.constant 0 : index
    %0 = vector.load %arg1[%c0, %c0_0] : memref<8x1024xf32, #tpu.memory_space<vmem>>, vector<8x1024xf32>
    %cst = arith.constant -5.000000e+01 : f32
    %1 = vector.broadcast %cst : f32 to vector<8x1024xf32>
    %2 = arith.mulf %1, %0 : vector<8x1024xf32>
    %3 = arith.mulf %2, %0 : vector<8x1024xf32>
    %4 = math.exp %3 : vector<8x1024xf32>
    %c0_1 = arith.constant 0 : index
    %c0_2 = arith.constant 0 : index
    %5 = vector.load %arg2[%c0_1, %c0_2] : memref<8x1024xf32, #tpu.memory_space<vmem>>, vector<8x1024xf32>
    tpu.vector_store %arg2[%c0_1, %c0_2], %4 {strides = array<i32>} : memref<8x1024xf32, #tpu.memory_space<vmem>>, vector<8x1024xf32>,
    return
  }
  func.func @transform_0(%arg0: i32) -> (i32, i32) {
    %c0_i32 = arith.constant 0 : i32
    %c0_i32_0 = arith.constant 0 : i32
    return %arg0, %c0_i32 : i32, i32
  }
  func.func @transform_1(%arg0: i32) -> (i32, i32) {
    %c0_i32 = arith.constant 0 : i32
    %c0_i32_0 = arith.constant 0 : i32
    return %arg0, %c0_i32 : i32, i32
  }
}

</mosaic_0001>

<bundles_post_ra>
// kernel: tpu_custom_call.1
= control target key start
LH: loop header
LB: loop body
LE: loop exit
PB: predicated region body
PF: predicated region fallthrough
CT: control target
= control target key end

     0   :  { %6 = vsyncpa [#allocation3], 0  ;;  %s190_s0 = inlined_call_operand.hbm [shape: f32[2,1024], index: 0, kind: input, shape index: {}]   ;;  %s191_s1 = inlined_call_operand.hbm [shape: f32[2,1024], index: 1, kind: output, shape index: {}]  }
   0x1   :  { %7 = vsyncpa [#allocation4], 0 }
   0x2   :  { %11 = vsyncadd [#allocation3], 768  ;;  %s12_s8 = sshll.u32 %s190_s0, 4  ;;  %s164_s9 = smov [#allocation2]   ;;  %s13_s8 = int_to_ptr.hbm [resolvable:$true] %s12_s8 }
   0x3   :  { %s14_s10 = sshll.u32 %s164_s9, 4  ;;  %s165_s11 = smov 256   ;;  %s15_s10 = int_to_ptr.vmem [resolvable:$true] %s14_s10 }
   0x4   :  { %s166_s12 = smov 16  }
   0x5   :  { %20 = dma.hbm_to_vmem [thread:$0]  %s13_s8, 256, %s15_s10, [#allocation3], %s165_s11, %s165_s11, %s166_s12  }
   0x6   :  { %160 = dma.done.wait [#allocation3], 1024  }
   0x7   :  { %161 = vsyncadd [#allocation3], 4294966272  ;;  %v25_v0 = vld [vmem:[#allocation2] sm:$0xff]  ;;  %v26_v1 = vld [vmem:[#allocation2 + $0x8] sm:$0xff] }
   0x8   :  { %v27_v2 = vld [vmem:[#allocation2 + $0x10] sm:$0xff]  ;;  %v33_v3 = vmul.f32 -50.0, %v25_v0  ;;  %v34_v4 = vmul.f32 -50.0, %v26_v1  ;;  %v28_v6 = vld [vmem:[#allocation2 + $0x18] sm:$0xff]  ;;  %v29_v7 = vld [vmem:[#allocation2 + $0x20] sm:$0xff] }
   0x9   :  { %v35_v5 = vmul.f32 -50.0, %v27_v2  ;;  %v30_v8 = vld [vmem:[#allocation2 + $0x28] sm:$0xff]  ;;  %v36_v9 = vmul.f32 -50.0, %v28_v6  ;;  %v37_v10 = vmul.f32 -50.0, %v29_v7  ;;  %v31_v12 = vld [vmem:[#allocation2 + $0x30] sm:$0xff]  ;;  %v32_v13 = vld [vmem:[#allocation2 + $0x38] sm:$0xff] }
   0xa   :  { %v38_v11 = vmul.f32 -50.0, %v30_v8  ;;  %v41_v14 = vmul.f32 %v33_v3, %v25_v0  ;;  %v42_v15 = vmul.f32 %v34_v4, %v26_v1  ;;  %v39_v17 = vmul.f32 -50.0, %v31_v12 }
   0xb   :  { %v43_v16 = vmul.f32 %v35_v5, %v27_v2  ;;  %v44_v18 = vmul.f32 %v36_v9, %v28_v6  ;;  %v45_v19 = vmul.f32 %v37_v10, %v29_v7  ;;  %v40_v21 = vmul.f32 -50.0, %v32_v13 }
   0xc   :  { %v46_v20 = vmul.f32 %v38_v11, %v30_v8  ;;  %v49_v22 = vmul.f32 1.442695, %v41_v14  ;;  %v51_v23 = vmul.f32 1.442695, %v42_v15  ;;  %v47_v25 = vmul.f32 %v39_v17, %v31_v12 }
   0xd   :  { %v53_v24 = vmul.f32 1.442695, %v43_v16  ;;  %v55_v26 = vmul.f32 1.442695, %v44_v18  ;;  %v48_v27 = vmul.f32 %v40_v21, %v32_v13  ;;  %v57_v28 = vmul.f32 1.442695, %v45_v19 }
   0xe   :  { %96 = vpow2.f32 %v49_v22  ;;  %v59_v29 = vmul.f32 1.442695, %v46_v20  ;;  %v61_v30 = vmul.f32 1.442695, %v47_v25 }
   0xf   :  { %98 = vpow2.f32 %v51_v23  ;;  %v63_v31 = vmul.f32 1.442695, %v48_v27 }
  0x10   :  { %100 = vpow2.f32 %v53_v24 }
  0x11   :  { %102 = vpow2.f32 %v55_v26 }
  0x12   :  { %104 = vpow2.f32 %v57_v28 }
  0x13   :  { %106 = vpow2.f32 %v59_v29 }
  0x14   :  { %v97_v32 = vpop.eup %96  ;;  %108 = vpow2.f32 %v61_v30 }
  0x15   :  { %v99_v33 = vpop.eup %98  ;;  %65 = vst [vmem:[#allocation5] sm:$0xff] %v97_v32  ;;  %110 = vpow2.f32 %v63_v31 }
  0x16   :  { %v101_v34 = vpop.eup %100  ;;  %66 = vst [vmem:[#allocation5 + $0x8] sm:$0xff] %v99_v33 }
  0x17   :  { %v103_v35 = vpop.eup %102  ;;  %67 = vst [vmem:[#allocation5 + $0x10] sm:$0xff] %v101_v34 }
  0x18   :  { %v105_v36 = vpop.eup %104  ;;  %68 = vst [vmem:[#allocation5 + $0x18] sm:$0xff] %v103_v35 }
  0x19   :  { %v107_v37 = vpop.eup %106  ;;  %69 = vst [vmem:[#allocation5 + $0x20] sm:$0xff] %v105_v36 }
  0x1a   :  { %v109_v38 = vpop.eup %108  ;;  %70 = vst [vmem:[#allocation5 + $0x28] sm:$0xff] %v107_v37 }
  0x1b   :  { %v111_v39 = vpop.eup %110  ;;  %71 = vst [vmem:[#allocation5 + $0x30] sm:$0xff] %v109_v38 }
  0x1c   :  { %72 = vst [vmem:[#allocation5 + $0x38] sm:$0xff] %v111_v39 }
  0x1d   :  { %76 = vsyncadd [#allocation4], 768  ;;  %s79_s14 = sshll.u32 %s191_s1, 4  ;;  %s167_s15 = smov [#allocation5]   ;;  %s80_s14 = int_to_ptr.hbm [resolvable:$true] %s79_s14 }
  0x1e   :  { %s77_s16 = sshll.u32 %s167_s15, 4  ;;  %s78_s16 = int_to_ptr.vmem [resolvable:$true] %s77_s16 }
  0x1f   :  { %85 = dma.vmem_to_hbm [thread:$0]  %s78_s16, 256, %s80_s14, [#allocation4], %s165_s11, %s165_s11, %s166_s12  }
  0x20   :  { %162 = dma.done.wait [#allocation4], 1024  }
  0x21   :  { %163 = vsyncadd [#allocation4], 4294966272 }
  0x22   :  { %90 = vsyncpa [#allocation3], 1 }
  0x23   :  { %91 = vsyncpa [#allocation4], 1 }

</bundles_post_ra>
